<compile_context>
chip_gen: v7x
topology: tpu7x:2x2x1
jax: 0.10.0
libtpu: 0.0.40
codegen_flags: <defaults>
</compile_context>

<pallas_src>
import jax
import jax.numpy as jnp
from jax.experimental import pallas as pl
from jax.experimental.pallas import tpu as pltpu


def _round_up(x: int, m: int) -> int:
    return ((x + m - 1) // m) * m


def _round_down(x: int, m: int) -> int:
    return (x // m) * m


def _vmem_budgets():
    """Generation-aware (tile_b byte budget, vmem_limit_bytes, force >=2 grid steps)."""
    vmem_bytes = None
    try:
        info = pltpu.get_tpu_info()
        for attr in ("vmem_capacity_bytes", "vmem_bytes", "vmem_size_bytes"):
            val = getattr(info, attr, None)
            if val:
                vmem_bytes = int(val)
                break
    except Exception:
        vmem_bytes = None
    if vmem_bytes is None:
        vmem_bytes = 64 * 1024 * 1024          # conservative: assume v7x-sized VMEM
    if vmem_bytes >= 100 * 1024 * 1024:        # v5e / v6e: 128 MiB physical VMEM
        return 64 * 1024 * 1024, 96 * 1024 * 1024, False
    # v7x-like: 64 MiB per TensorCore, 2 TensorCores per chip -> keep headroom and
    # make sure the "parallel" grid has at least 2 steps so both TCs get work.
    return 28 * 1024 * 1024, 48 * 1024 * 1024, True


def _vis_softdot_kernel(h_ref, vc_ref, wh_ref, bh_ref, wvt_ref, wctx_ref, attn_ref):
    """One batch-tile of the attention layer.

    h_ref    : (TB, h_dim)          input dtype
    vc_ref   : (TB, v_num, v_dim)   input dtype (unpadded)
    wh_ref   : (h_dim, dot)  matmul dtype
    bh_ref   : (1, dot)      float32
    wvt_ref  : (dot, v_dim)  matmul dtype   (Wv transposed: folded projection)
    wctx_ref : (TB, v_dim)   output, input dtype
    attn_ref : (TB, attn_pad) output, float32 (lane-dense; cols >= v_num are zero)
    """
    tb, v_num, v_dim = vc_ref.shape
    attn_pad = attn_ref.shape[1]
    mxu_dtype = wh_ref.dtype

    # ---- query-side projections on the MXU (f32 accumulation) ------------------
    target = jnp.dot(h_ref[...].astype(mxu_dtype), wh_ref[...],
                     preferred_element_type=jnp.float32)
    target = target + bh_ref[...]                                  # (TB, dot) f32

    # Folded visual projection: wt = target @ Wv^T.  The bv·target term is constant
    # over n and softmax is shift-invariant, so bv is dropped entirely.
    wt = jnp.dot(target.astype(mxu_dtype), wvt_ref[...],
                 preferred_element_type=jnp.float32)               # (TB, v_dim) f32

    # ---- logits: one (TB, v_dim) slab of vc at a time (VPU mult + XLU lane reduce).
    # No (TB, N, V) f32 intermediate is ever materialized.
    cols = []
    for n in range(v_num):
        slab = vc_ref[:, n, :]                                     # input dtype
        cols.append(jnp.sum(slab * wt, axis=-1, keepdims=True))    # (TB, 1) f32
    logits = jnp.concatenate(cols, axis=-1)                        # (TB, v_num) f32

    # ---- softmax over v_num (f32 math; EUP reciprocal + one Newton step) --------
    m = jnp.max(logits, axis=-1, keepdims=True)
    e = jnp.exp(logits - m)
    denom = jnp.sum(e, axis=-1, keepdims=True)
    inv = pl.reciprocal(denom, approx=True)
    inv = inv * (2.0 - denom * inv)
    attn = e * inv                                                 # (TB, v_num) f32

    if attn_pad > v_num:                                           # lane-dense store
        attn_out = jnp.concatenate(
            [attn, jnp.zeros((tb, attn_pad - v_num), jnp.float32)], axis=-1)
    else:
        attn_out = attn
    attn_ref[...] = attn_out.astype(attn_ref.dtype)

    # ---- weighted context: f32 accumulator, one slab at a time (no f32 vc copy) --
    acc = jnp.zeros((tb, v_dim), jnp.float32)
    for n in range(v_num):
        acc = acc + attn[:, n:n + 1] * vc_ref[:, n, :]             # f32 * input dtype
    wctx_ref[...] = acc.astype(wctx_ref.dtype)


def visual_soft_dot_attention(h, visual_context, wh, bh, wv, bv, *,
                              tile_b=None, matmul_dtype=None):
    """VisualSoftDotAttention as a batch-gridded Pallas kernel.

    h               : (B, h_dim)
    visual_context  : (B, v_num, v_dim)
    wh : (h_dim, dot_dim), bh : (dot_dim,)
    wv : (v_dim, dot_dim), bv : (dot_dim,)   (bv cancels in the softmax; unused)
    matmul_dtype    : dtype for MXU operands (default: input dtype).  Pass
                      jnp.bfloat16 with f32 inputs for faster MXU at ~1e-2 logits
                      accuracy (see perf review).
    Returns (weighted_context (B, v_dim) in h.dtype, attn (B, v_num) float32).
    """
    B, h_dim = h.shape
    bb, v_num, v_dim = visual_context.shape
    assert bb == B
    assert wh.shape[0] == h_dim and wv.shape[0] == v_dim
    dot_dim = wh.shape[1]

    in_dtype = h.dtype
    itemsize = jnp.dtype(in_dtype).itemsize
    if matmul_dtype is None:
        matmul_dtype = in_dtype
    matmul_dtype = jnp.dtype(matmul_dtype)
    mm_itemsize = matmul_dtype.itemsize

    # Weight prep (one-time, weight-sized): fold needs Wv^T; bv is dropped (softmax
    # shift-invariance; `context` itself is never an output).
    wh_c = wh.astype(matmul_dtype)                     # (h_dim, dot)
    wvt_c = wv.T.astype(matmul_dtype)                  # (dot, v_dim)
    bh_2d = bh.reshape(1, dot_dim).astype(jnp.float32)

    attn_pad = _round_up(v_num, 128)                   # lane-dense attn output

    budget, vmem_limit, want_two_steps = _vmem_budgets()

    if tile_b is None:
        # Resident (still double-buffered) weights + per-row streaming / scratch bytes.
        fixed = 2 * ((h_dim * dot_dim + dot_dim * v_dim) * mm_itemsize + dot_dim * 4)
        per_row = (2 * (v_num * v_dim + h_dim) * itemsize          # 2x-buffered inputs
                   + 2 * (v_dim * itemsize + attn_pad * 4)         # 2x-buffered outputs
                   + 4 * (3 * v_dim + dot_dim + 2 * attn_pad))     # f32 scratch (wt/acc/slab/target/logits)
        tile_b = max(8, min(512, (budget - fixed) // max(per_row, 1)))

    if want_two_steps and B >= 16:
        # v7x: 2 TensorCores per chip -> guarantee >= 2 "parallel" grid steps.
        tile_b = min(tile_b, _round_up(-(-B // 2), 8))

    if tile_b >= B:
        tile_b = B                                     # single full-extent batch block
    else:
        tile_b = max(8, _round_down(tile_b, 8))        # sublane-aligned batch tile

    grid = (pl.cdiv(B, tile_b),)                       # ragged last tile: edge clipping

    flops = 2 * B * (h_dim * dot_dim + dot_dim * v_dim + 2 * v_num * v_dim)
    bytes_accessed = ((h.size + visual_context.size) * itemsize
                      + (wh_c.size + wvt_c.size) * mm_itemsize + bh_2d.size * 4
                      + B * v_dim * itemsize + B * attn_pad * 4)

    # TODO(synk): at very small B (< ~8) a pure-JAX/XLA path is cheaper than the
    # kernel launch; route at the call site if that matters.
    # TODO(synk): if xprof still shows exposed DMA on the vc stream, add
    # pipeline_mode=pl.Buffered(3) to the vc BlockSpec (costs one extra vc tile of VMEM).
    wctx, attn_full = pl.pallas_call(
        _vis_softdot_kernel,
        out_shape=(
            jax.ShapeDtypeStruct((B, v_dim), in_dtype),        # weighted_context
            jax.ShapeDtypeStruct((B, attn_pad), jnp.float32),  # attn (lane-dense)
        ),
        grid_spec=pltpu.PrefetchScalarGridSpec(
            num_scalar_prefetch=0,
            grid=grid,
            in_specs=[
                pl.BlockSpec((tile_b, h_dim), lambda i: (i, 0)),
                pl.BlockSpec((tile_b, v_num, v_dim), lambda i: (i, 0, 0)),  # unpadded
                pl.BlockSpec((h_dim, dot_dim), lambda i: (0, 0)),   # resident weights
                pl.BlockSpec((1, dot_dim), lambda i: (0, 0)),
                pl.BlockSpec((dot_dim, v_dim), lambda i: (0, 0)),
            ],
            out_specs=(
                pl.BlockSpec((tile_b, v_dim), lambda i: (i, 0)),
                pl.BlockSpec((tile_b, attn_pad), lambda i: (i, 0)),
            ),
        ),
        compiler_params=pltpu.CompilerParams(
            dimension_semantics=("parallel",),
            vmem_limit_bytes=int(vmem_limit),
        ),
        cost_estimate=pl.CostEstimate(
            flops=int(flops),
            transcendentals=int(B * v_num),
            bytes_accessed=int(bytes_accessed),
        ),
    )(h, visual_context, wh_c, bh_2d, wvt_c)

    return wctx, attn_full[:, :v_num]


def _reference(h, visual_context, wh, bh, wv, bv):
    """Pure-JAX reference mirroring the PyTorch forward (f32 math)."""
    target = h @ wh + bh
    context = jnp.einsum("bnd,dk->bnk", visual_context, wv) + bv
    logits = jnp.einsum("bnk,bk->bn", context, target)
    attn = jax.nn.softmax(logits, axis=1)
    wctx = jnp.einsum("bn,bnd->bd", attn, visual_context)
    return wctx, attn


def _make_inputs(key, B, h_dim, v_num, v_dim, dot_dim):
    k_h, k_vc, k_wh, k_bh, k_wv, k_bv = jax.random.split(key, 6)
    h = jax.random.normal(k_h, (B, h_dim), dtype=jnp.float32)
    vc = jax.random.normal(k_vc, (B, v_num, v_dim), dtype=jnp.float32)
    lim_h = 1.0 / (h_dim ** 0.5)
    lim_v = 1.0 / (v_dim ** 0.5)
    wh = jax.random.uniform(k_wh, (h_dim, dot_dim), jnp.float32, -lim_h, lim_h)
    bh = jax.random.uniform(k_bh, (dot_dim,), jnp.float32, -lim_h, lim_h)
    wv = jax.random.uniform(k_wv, (v_dim, dot_dim), jnp.float32, -lim_v, lim_v)
    bv = jax.random.uniform(k_bv, (dot_dim,), jnp.float32, -lim_v, lim_v)
    return h, vc, wh, bh, wv, bv


if __name__ == "__main__":
    key = jax.random.PRNGKey(0)
    k1, k2, k3 = jax.random.split(key, 3)

    # Test 1: module-default dot_dim=256, tiny batch (single grid step), exact f32 MXU.
    B, h_dim, v_num, v_dim, dot_dim = 2, 32, 8, 64, 256
    h, vc, wh, bh, wv, bv = _make_inputs(k1, B, h_dim, v_num, v_dim, dot_dim)
    wctx, attn = visual_soft_dot_attention(h, vc, wh, bh, wv, bv)
    jax.block_until_ready((wctx, attn))
    wctx_r, attn_r = _reference(h, vc, wh, bh, wv, bv)
    assert wctx.shape == (B, v_dim) and attn.shape == (B, v_num)
    assert jnp.allclose(wctx, wctx_r, atol=1e-4, rtol=1e-4)
    assert jnp.allclose(attn, attn_r, atol=1e-4, rtol=1e-4)

    # Test 2: odd sizes + forced multi-step grid with a ragged last batch tile
    # (exercises edge clipping; visual_context is never padded in HBM).
    B, h_dim, v_num, v_dim, dot_dim = 20, 40, 6, 100, 80
    h, vc, wh, bh, wv, bv = _make_inputs(k2, B, h_dim, v_num, v_dim, dot_dim)
    wctx, attn = visual_soft_dot_attention(h, vc, wh, bh, wv, bv, tile_b=8)
    jax.block_until_ready((wctx, attn))
    wctx_r, attn_r = _reference(h, vc, wh, bh, wv, bv)
    assert wctx.shape == (B, v_dim) and attn.shape == (B, v_num)
    assert jnp.allclose(wctx, wctx_r, atol=1e-4, rtol=1e-4)
    assert jnp.allclose(attn, attn_r, atol=1e-4, rtol=1e-4)

    # Test 3: bf16 MXU operands for f32 callers (perf-review item); tolerance relaxed
    # per the review's correctness note (expect ~1e-2-level logits error).
    B, h_dim, v_num, v_dim, dot_dim = 16, 16, 12, 128, 64
    h, vc, wh, bh, wv, bv = _make_inputs(k3, B, h_dim, v_num, v_dim, dot_dim)
    wctx, attn = visual_soft_dot_attention(h, vc, wh, bh, wv, bv,
                                           matmul_dtype=jnp.bfloat16)
    jax.block_until_ready((wctx, attn))
    wctx_r, attn_r = _reference(h, vc, wh, bh, wv, bv)
    assert jnp.allclose(attn.sum(axis=1), 1.0, atol=1e-3)
    assert jnp.allclose(wctx, wctx_r, atol=8e-2, rtol=8e-2)
    assert jnp.allclose(attn, attn_r, atol=8e-2, rtol=8e-2)

    print("KERNEL_OK")
</pallas_src>

<mosaic_0001>
module attributes {stable_mosaic.version = 11 : i64} {
  func.func @_vis_softdot_kernel(%arg0: i32, %arg1: memref<2x32xf32, #tpu.memory_space<vmem>>, %arg2: memref<2x8x64xf32, #tpu.memory_space<vmem>>, %arg3: memref<32x256xf32, #tpu.memory_space<vmem>>, %arg4: memref<1x256xf32, #tpu.memory_space<vmem>>, %arg5: memref<256x64xf32, #tpu.memory_space<vmem>>, %arg6: memref<2x64xf32, #tpu.memory_space<vmem>>, %arg7: memref<2x128xf32, #tpu.memory_space<vmem>>) attributes {dimension_semantics = [#tpu.dimension_semantics<parallel>], iteration_bounds = array<i64: 1>, scalar_prefetch = 0 : i64, scratch_operands = 0 : i64, tpu.core_type = #tpu.core_type<tc>, window_params = [{transform_indices = @transform_0, window_bounds = array<i64: 2, 32>}, {transform_indices = @transform_1, window_bounds = array<i64: 2, 8, 64>}, {pipeline_mode = #tpu.pipeline_mode<synchronous>, transform_indices = @transform_2, window_bounds = array<i64: 32, 256>}, {pipeline_mode = #tpu.pipeline_mode<synchronous>, transform_indices = @transform_3, window_bounds = array<i64: 1, 256>}, {pipeline_mode = #tpu.pipeline_mode<synchronous>, transform_indices = @transform_4, window_bounds = array<i64: 256, 64>}, {transform_indices = @transform_5, window_bounds = array<i64: 2, 64>}, {transform_indices = @transform_6, window_bounds = array<i64: 2, 128>}]} {
    %c0 = arith.constant 0 : index
    %c0_0 = arith.constant 0 : index
    %0 = vector.load %arg1[%c0, %c0_0] : memref<2x32xf32, #tpu.memory_space<vmem>>, vector<2x32xf32>
    %c0_1 = arith.constant 0 : index
    %c0_2 = arith.constant 0 : index
    %1 = vector.load %arg3[%c0_1, %c0_2] : memref<32x256xf32, #tpu.memory_space<vmem>>, vector<32x256xf32>
    %cst = arith.constant dense<0.000000e+00> : vector<2x256xf32>
    %2 = tpu.matmul %0, %1, %cst {dimension_numbers = #tpu.dot_dimension_numbers<[1], [0], [0], [1], [0, 0, 1, 1], [], []>} : vector<2x32xf32>, vector<32x256xf32>, vector<2x256xf32> -> vector<2x256xf32>
    %c0_3 = arith.constant 0 : index
    %c0_4 = arith.constant 0 : index
    %3 = vector.load %arg4[%c0_3, %c0_4] : memref<1x256xf32, #tpu.memory_space<vmem>>, vector<1x256xf32>
    %4 = vector.broadcast %3 : vector<1x256xf32> to vector<2x256xf32>
    %5 = arith.addf %2, %4 : vector<2x256xf32>
    %c0_5 = arith.constant 0 : index
    %c0_6 = arith.constant 0 : index
    %6 = vector.load %arg5[%c0_5, %c0_6] : memref<256x64xf32, #tpu.memory_space<vmem>>, vector<256x64xf32>
    %cst_7 = arith.constant dense<0.000000e+00> : vector<2x64xf32>
    %7 = tpu.matmul %5, %6, %cst_7 {dimension_numbers = #tpu.dot_dimension_numbers<[1], [0], [0], [1], [0, 0, 1, 1], [], []>} : vector<2x256xf32>, vector<256x64xf32>, vector<2x64xf32> -> vector<2x64xf32>
    %c0_8 = arith.constant 0 : index
    %c0_9 = arith.constant 0 : index
    %c0_10 = arith.constant 0 : index
    %8 = vector.load %arg2[%c0_8, %c0_9, %c0_10] : memref<2x8x64xf32, #tpu.memory_space<vmem>>, vector<2x1x64xf32>
    %9 = vector.shape_cast %8 : vector<2x1x64xf32> to vector<2x64xf32>
    %10 = arith.mulf %9, %7 : vector<2x64xf32>
    %cst_11 = arith.constant dense<0.000000e+00> : vector<2xf32>
    %11 = vector.multi_reduction <add>, %10, %cst_11 [1] : vector<2x64xf32> to vector<2xf32>
    %12 = vector.shape_cast %11 : vector<2xf32> to vector<2x1xf32>
    %c0_12 = arith.constant 0 : index
    %c1 = arith.constant 1 : index
    %c0_13 = arith.constant 0 : index
    %13 = vector.load %arg2[%c0_12, %c1, %c0_13] : memref<2x8x64xf32, #tpu.memory_space<vmem>>, vector<2x1x64xf32>
    %14 = vector.shape_cast %13 : vector<2x1x64xf32> to vector<2x64xf32>
    %15 = arith.mulf %14, %7 : vector<2x64xf32>
    %cst_14 = arith.constant dense<0.000000e+00> : vector<2xf32>
    %16 = vector.multi_reduction <add>, %15, %cst_14 [1] : vector<2x64xf32> to vector<2xf32>
    %17 = vector.shape_cast %16 : vector<2xf32> to vector<2x1xf32>
    %c0_15 = arith.constant 0 : index
    %c2 = arith.constant 2 : index
    %c0_16 = arith.constant 0 : index
    %18 = vector.load %arg2[%c0_15, %c2, %c0_16] : memref<2x8x64xf32, #tpu.memory_space<vmem>>, vector<2x1x64xf32>
    %19 = vector.shape_cast %18 : vector<2x1x64xf32> to vector<2x64xf32>
    %20 = arith.mulf %19, %7 : vector<2x64xf32>
    %cst_17 = arith.constant dense<0.000000e+00> : vector<2xf32>
    %21 = vector.multi_reduction <add>, %20, %cst_17 [1] : vector<2x64xf32> to vector<2xf32>
    %22 = vector.shape_cast %21 : vector<2xf32> to vector<2x1xf32>
    %c0_18 = arith.constant 0 : index
    %c3 = arith.constant 3 : index
    %c0_19 = arith.constant 0 : index
    %23 = vector.load %arg2[%c0_18, %c3, %c0_19] : memref<2x8x64xf32, #tpu.memory_space<vmem>>, vector<2x1x64xf32>
    %24 = vector.shape_cast %23 : vector<2x1x64xf32> to vector<2x64xf32>
    %25 = arith.mulf %24, %7 : vector<2x64xf32>
    %cst_20 = arith.constant dense<0.000000e+00> : vector<2xf32>
    %26 = vector.multi_reduction <add>, %25, %cst_20 [1] : vector<2x64xf32> to vector<2xf32>
    %27 = vector.shape_cast %26 : vector<2xf32> to vector<2x1xf32>
    %c0_21 = arith.constant 0 : index
    %c4 = arith.constant 4 : index
    %c0_22 = arith.constant 0 : index
    %28 = vector.load %arg2[%c0_21, %c4, %c0_22] : memref<2x8x64xf32, #tpu.memory_space<vmem>>, vector<2x1x64xf32>
    %29 = vector.shape_cast %28 : vector<2x1x64xf32> to vector<2x64xf32>
    %30 = arith.mulf %29, %7 : vector<2x64xf32>
    %cst_23 = arith.constant dense<0.000000e+00> : vector<2xf32>
    %31 = vector.multi_reduction <add>, %30, %cst_23 [1] : vector<2x64xf32> to vector<2xf32>
    %32 = vector.shape_cast %31 : vector<2xf32> to vector<2x1xf32>
    %c0_24 = arith.constant 0 : index
    %c5 = arith.constant 5 : index
    %c0_25 = arith.constant 0 : index
    %33 = vector.load %arg2[%c0_24, %c5, %c0_25] : memref<2x8x64xf32, #tpu.memory_space<vmem>>, vector<2x1x64xf32>
    %34 = vector.shape_cast %33 : vector<2x1x64xf32> to vector<2x64xf32>
    %35 = arith.mulf %34, %7 : vector<2x64xf32>
    %cst_26 = arith.constant dense<0.000000e+00> : vector<2xf32>
    %36 = vector.multi_reduction <add>, %35, %cst_26 [1] : vector<2x64xf32> to vector<2xf32>
    %37 = vector.shape_cast %36 : vector<2xf32> to vector<2x1xf32>
    %c0_27 = arith.constant 0 : index
    %c6 = arith.constant 6 : index
    %c0_28 = arith.constant 0 : index
    %38 = vector.load %arg2[%c0_27, %c6, %c0_28] : memref<2x8x64xf32, #tpu.memory_space<vmem>>, vector<2x1x64xf32>
    %39 = vector.shape_cast %38 : vector<2x1x64xf32> to vector<2x64xf32>
    %40 = arith.mulf %39, %7 : vector<2x64xf32>
    %cst_29 = arith.constant dense<0.000000e+00> : vector<2xf32>
    %41 = vector.multi_reduction <add>, %40, %cst_29 [1] : vector<2x64xf32> to vector<2xf32>
    %42 = vector.shape_cast %41 : vector<2xf32> to vector<2x1xf32>
    %c0_30 = arith.constant 0 : index
    %c7 = arith.constant 7 : index
    %c0_31 = arith.constant 0 : index
    %43 = vector.load %arg2[%c0_30, %c7, %c0_31] : memref<2x8x64xf32, #tpu.memory_space<vmem>>, vector<2x1x64xf32>
    %44 = vector.shape_cast %43 : vector<2x1x64xf32> to vector<2x64xf32>
    %45 = arith.mulf %44, %7 : vector<2x64xf32>
    %cst_32 = arith.constant dense<0.000000e+00> : vector<2xf32>
    %46 = vector.multi_reduction <add>, %45, %cst_32 [1] : vector<2x64xf32> to vector<2xf32>
    %47 = vector.shape_cast %46 : vector<2xf32> to vector<2x1xf32>
    %48 = tpu.concatenate %12, %17, %22, %27, %32, %37, %42, %47 in 1 : vector<2x1xf32>, vector<2x1xf32>, vector<2x1xf32>, vector<2x1xf32>, vector<2x1xf32>, vector<2x1xf32>, vector<2x1xf32>, vector<2x1xf32> -> vector<2x8xf32>
    %cst_33 = arith.constant dense<0xFF800000> : vector<2xf32>
    %49 = vector.multi_reduction <maximumf>, %48, %cst_33 [1] : vector<2x8xf32> to vector<2xf32>
    %50 = vector.shape_cast %49 : vector<2xf32> to vector<2x1xf32>
    %51 = vector.broadcast %50 : vector<2x1xf32> to vector<2x8xf32>
    %52 = arith.subf %48, %51 : vector<2x8xf32>
    %53 = math.exp %52 : vector<2x8xf32>
    %cst_34 = arith.constant dense<0.000000e+00> : vector<2xf32>
    %54 = vector.multi_reduction <add>, %53, %cst_34 [1] : vector<2x8xf32> to vector<2xf32>
    %55 = vector.shape_cast %54 : vector<2xf32> to vector<2x1xf32>
    %56 = tpu.reciprocal %55 {approx = true} : vector<2x1xf32> -> vector<2x1xf32>
    %57 = arith.mulf %55, %56 : vector<2x1xf32>
    %cst_35 = arith.constant 2.000000e+00 : f32
    %58 = vector.broadcast %cst_35 : f32 to vector<2x1xf32>
    %59 = arith.subf %58, %57 : vector<2x1xf32>
    %60 = arith.mulf %56, %59 : vector<2x1xf32>
    %61 = vector.broadcast %60 : vector<2x1xf32> to vector<2x8xf32>
    %62 = arith.mulf %53, %61 : vector<2x8xf32>
    %cst_36 = arith.constant 0.000000e+00 : f32
    %63 = vector.broadcast %cst_36 : f32 to vector<2x120xf32>
    %64 = tpu.concatenate %62, %63 in 1 : vector<2x8xf32>, vector<2x120xf32> -> vector<2x128xf32>
    %c0_37 = arith.constant 0 : index
    %c0_38 = arith.constant 0 : index
    %65 = vector.load %arg7[%c0_37, %c0_38] : memref<2x128xf32, #tpu.memory_space<vmem>>, vector<2x128xf32>
    tpu.vector_store %arg7[%c0_37, %c0_38], %64 {strides = array<i32>} : memref<2x128xf32, #tpu.memory_space<vmem>>, vector<2x128xf32>,
    %cst_39 = arith.constant 0.000000e+00 : f32
    %66 = vector.broadcast %cst_39 : f32 to vector<2x64xf32>
    %67 = vector.extract_strided_slice %62 {offsets = [0, 0], sizes = [2, 1], strides = [1, 1]} : vector<2x8xf32> to vector<2x1xf32>
    %c0_40 = arith.constant 0 : index
    %c0_41 = arith.constant 0 : index
    %c0_42 = arith.constant 0 : index
    %68 = vector.load %arg2[%c0_40, %c0_41, %c0_42] : memref<2x8x64xf32, #tpu.memory_space<vmem>>, vector<2x1x64xf32>
    %69 = vector.shape_cast %68 : vector<2x1x64xf32> to vector<2x64xf32>
    %70 = vector.broadcast %67 : vector<2x1xf32> to vector<2x64xf32>
    %71 = arith.mulf %70, %69 : vector<2x64xf32>
    %72 = arith.addf %66, %71 : vector<2x64xf32>
    %73 = vector.extract_strided_slice %62 {offsets = [0, 1], sizes = [2, 1], strides = [1, 1]} : vector<2x8xf32> to vector<2x1xf32>
    %c0_43 = arith.constant 0 : index
    %c1_44 = arith.constant 1 : index
    %c0_45 = arith.constant 0 : index
    %74 = vector.load %arg2[%c0_43, %c1_44, %c0_45] : memref<2x8x64xf32, #tpu.memory_space<vmem>>, vector<2x1x64xf32>
    %75 = vector.shape_cast %74 : vector<2x1x64xf32> to vector<2x64xf32>
    %76 = vector.broadcast %73 : vector<2x1xf32> to vector<2x64xf32>
    %77 = arith.mulf %76, %75 : vector<2x64xf32>
    %78 = arith.addf %72, %77 : vector<2x64xf32>
    %79 = vector.extract_strided_slice %62 {offsets = [0, 2], sizes = [2, 1], strides = [1, 1]} : vector<2x8xf32> to vector<2x1xf32>
    %c0_46 = arith.constant 0 : index
    %c2_47 = arith.constant 2 : index
    %c0_48 = arith.constant 0 : index
    %80 = vector.load %arg2[%c0_46, %c2_47, %c0_48] : memref<2x8x64xf32, #tpu.memory_space<vmem>>, vector<2x1x64xf32>
    %81 = vector.shape_cast %80 : vector<2x1x64xf32> to vector<2x64xf32>
    %82 = vector.broadcast %79 : vector<2x1xf32> to vector<2x64xf32>
    %83 = arith.mulf %82, %81 : vector<2x64xf32>
    %84 = arith.addf %78, %83 : vector<2x64xf32>
    %85 = vector.extract_strided_slice %62 {offsets = [0, 3], sizes = [2, 1], strides = [1, 1]} : vector<2x8xf32> to vector<2x1xf32>
    %c0_49 = arith.constant 0 : index
    %c3_50 = arith.constant 3 : index
    %c0_51 = arith.constant 0 : index
    %86 = vector.load %arg2[%c0_49, %c3_50, %c0_51] : memref<2x8x64xf32, #tpu.memory_space<vmem>>, vector<2x1x64xf32>
    %87 = vector.shape_cast %86 : vector<2x1x64xf32> to vector<2x64xf32>
    %88 = vector.broadcast %85 : vector<2x1xf32> to vector<2x64xf32>
    %89 = arith.mulf %88, %87 : vector<2x64xf32>
    %90 = arith.addf %84, %89 : vector<2x64xf32>
    %91 = vector.extract_strided_slice %62 {offsets = [0, 4], sizes = [2, 1], strides = [1, 1]} : vector<2x8xf32> to vector<2x1xf32>
    %c0_52 = arith.constant 0 : index
    %c4_53 = arith.constant 4 : index
    %c0_54 = arith.constant 0 : index
    %92 = vector.load %arg2[%c0_52, %c4_53, %c0_54] : memref<2x8x64xf32, #tpu.memory_space<vmem>>, vector<2x1x64xf32>
    %93 = vector.shape_cast %92 : vector<2x1x64xf32> to vector<2x64xf32>
    %94 = vector.broadcast %91 : vector<2x1xf32> to vector<2x64xf32>
    %95 = arith.mulf %94, %93 : vector<2x64xf32>
    %96 = arith.addf %90, %95 : vector<2x64xf32>
    %97 = vector.extract_strided_slice %62 {offsets = [0, 5], sizes = [2, 1], strides = [1, 1]} : vector<2x8xf32> to vector<2x1xf32>
    %c0_55 = arith.constant 0 : index
    %c5_56 = arith.constant 5 : index
    %c0_57 = arith.constant 0 : index
    %98 = vector.load %arg2[%c0_55, %c5_56, %c0_57] : memref<2x8x64xf32, #tpu.memory_space<vmem>>, vector<2x1x64xf32>
    %99 = vector.shape_cast %98 : vector<2x1x64xf32> to vector<2x64xf32>
    %100 = vector.broadcast %97 : vector<2x1xf32> to vector<2x64xf32>
    %101 = arith.mulf %100, %99 : vector<2x64xf32>
    %102 = arith.addf %96, %101 : vector<2x64xf32>
    %103 = vector.extract_strided_slice %62 {offsets = [0, 6], sizes = [2, 1], strides = [1, 1]} : vector<2x8xf32> to vector<2x1xf32>
    %c0_58 = arith.constant 0 : index
    %c6_59 = arith.constant 6 : index
    %c0_60 = arith.constant 0 : index
    %104 = vector.load %arg2[%c0_58, %c6_59, %c0_60] : memref<2x8x64xf32, #tpu.memory_space<vmem>>, vector<2x1x64xf32>
    %105 = vector.shape_cast %104 : vector<2x1x64xf32> to vector<2x64xf32>
    %106 = vector.broadcast %103 : vector<2x1xf32> to vector<2x64xf32>
    %107 = arith.mulf %106, %105 : vector<2x64xf32>
    %108 = arith.addf %102, %107 : vector<2x64xf32>
    %109 = vector.extract_strided_slice %62 {offsets = [0, 7], sizes = [2, 1], strides = [1, 1]} : vector<2x8xf32> to vector<2x1xf32>
    %c0_61 = arith.constant 0 : index
    %c7_62 = arith.constant 7 : index
    %c0_63 = arith.constant 0 : index
    %110 = vector.load %arg2[%c0_61, %c7_62, %c0_63] : memref<2x8x64xf32, #tpu.memory_space<vmem>>, vector<2x1x64xf32>
    %111 = vector.shape_cast %110 : vector<2x1x64xf32> to vector<2x64xf32>
    %112 = vector.broadcast %109 : vector<2x1xf32> to vector<2x64xf32>
    %113 = arith.mulf %112, %111 : vector<2x64xf32>
    %114 = arith.addf %108, %113 : vector<2x64xf32>
    %c0_64 = arith.constant 0 : index
    %c0_65 = arith.constant 0 : index
    %115 = vector.load %arg6[%c0_64, %c0_65] : memref<2x64xf32, #tpu.memory_space<vmem>>, vector<2x64xf32>
    tpu.vector_store %arg6[%c0_64, %c0_65], %114 {strides = array<i32>} : memref<2x64xf32, #tpu.memory_space<vmem>>, vector<2x64xf32>,
    return
  }
  func.func @transform_0(%arg0: i32) -> (i32, i32) {
    %c0_i32 = arith.constant 0 : i32
    %c0_i32_0 = arith.constant 0 : i32
    return %arg0, %c0_i32 : i32, i32
  }
  func.func @transform_1(%arg0: i32) -> (i32, i32, i32) {
    %c0_i32 = arith.constant 0 : i32
    %c0_i32_0 = arith.constant 0 : i32
    %c0_i32_1 = arith.constant 0 : i32
    return %arg0, %c0_i32, %c0_i32_0 : i32, i32, i32
  }
  func.func @transform_2(%arg0: i32) -> (i32, i32) {
    %c0_i32 = arith.constant 0 : i32
    %c0_i32_0 = arith.constant 0 : i32
    %c0_i32_1 = arith.constant 0 : i32
    return %c0_i32, %c0_i32_0 : i32, i32
  }
  func.func @transform_3(%arg0: i32) -> (i32, i32) {
    %c0_i32 = arith.constant 0 : i32
    %c0_i32_0 = arith.constant 0 : i32
    %c0_i32_1 = arith.constant 0 : i32
    return %c0_i32, %c0_i32_0 : i32, i32
  }
  func.func @transform_4(%arg0: i32) -> (i32, i32) {
    %c0_i32 = arith.constant 0 : i32
    %c0_i32_0 = arith.constant 0 : i32
    %c0_i32_1 = arith.constant 0 : i32
    return %c0_i32, %c0_i32_0 : i32, i32
  }
  func.func @transform_5(%arg0: i32) -> (i32, i32) {
    %c0_i32 = arith.constant 0 : i32
    %c0_i32_0 = arith.constant 0 : i32
    return %arg0, %c0_i32 : i32, i32
  }
  func.func @transform_6(%arg0: i32) -> (i32, i32) {
    %c0_i32 = arith.constant 0 : i32
    %c0_i32_0 = arith.constant 0 : i32
    return %arg0, %c0_i32 : i32, i32
  }
}

</mosaic_0001>

<bundles_post_ra>
// kernel: tpu_custom_call.1
= control target key start
LH: loop header
LB: loop body
LE: loop exit
PB: predicated region body
PF: predicated region fallthrough
CT: control target
= control target key end

     0   :  { %12 = vsyncpa [#allocation3], 0  ;;  %v638_v7 = vmov 0.0   ;;  %vm45_vm0 = vcmask 261120   ;;  %s955_s0 = inlined_call_operand.vmem [shape: f32[2,32], index: 0, kind: input, shape index: {}]   ;;  %s956_s1 = inlined_call_operand.vmem [shape: f32[2,8,64], index: 1, kind: input, shape index: {}]   ;;  %s957_s2 = inlined_call_operand.vmem [shape: f32[32,256], index: 2, kind: input, shape index: {}]   ;;  %s958_s3 = inlined_call_operand.vmem [shape: f32[1,256], index: 3, kind: input, shape index: {}]   ;;  %s959_s4 = inlined_call_operand.vmem [shape: f32[256,64], index: 4, kind: input, shape index: {}]   ;;  %s960_s5 = inlined_call_operand.hbm [shape: f32[2,64], index: 5, kind: output, shape index: {0}]   ;;  %s961_s6 = inlined_call_operand.hbm [shape: f32[2,128], index: 6, kind: output, shape index: {1}]  }
   0x1   :  { %v26_v0 = vld [vmem:[%s957_s2 + $0x8] sm:$0xff]  ;;  %v28_v1 = vld [vmem:[%s957_s2 + $0x18] sm:$0xff]  ;;  %v25_v2 = vld [vmem:[%s957_s2] sm:$0xff]  ;;  %113 = vmatprep.mubr.f32.mxu0 %v638_v7 }
   0x2   :  { %v526_v3 = vpack.c.bf16 %v28_v1, %v26_v0  ;;  %v27_v4 = vld [vmem:[%s957_s2 + $0x10] sm:$0xff]  ;;  %v30_v5 = vld [vmem:[%s957_s2 + $0x28] sm:$0xff]  ;;  %v32_v6 = vld [vmem:[%s957_s2 + $0x38] sm:$0xff] }
   0x3   :  { %v528_v8 = vpack.c.bf16 %v27_v4, %v25_v2  ;;  %v530_v9 = vpack.c.bf16 %v32_v6, %v30_v5  ;;  %v29_v10 = vld [vmem:[%s957_s2 + $0x20] sm:$0xff]  ;;  %v31_v11 = vld [vmem:[%s957_s2 + $0x30] sm:$0xff]  ;;  %v137_v13 = vld [vmem:[%s959_s4 + $0x88] sm:$0xff] }
   0x4   :  { %527 = vmatprep.subr.bf16.mxu0 %v526_v3  ;;  %v136_v12 = vld [vmem:[%s959_s4 + $0x80] sm:$0xff]  ;;  %v532_v15 = vpack.c.bf16 %v31_v11, %v29_v10  ;;  %v121_v17 = vld [vmem:[%s959_s4 + $0x8] sm:$0xff]  ;;  %v138_v18 = vld [vmem:[%s959_s4 + $0x90] sm:$0xff] }
   0x5   :  { %v120_v14 = vld [vmem:[%s959_s4] sm:$0xff]  ;;  %529 = vmatpush1.bf16.msra.mxu0 %v528_v8  ;;  %v534_v16 = vpack.c.bf16 %v137_v13, %v136_v12  ;;  %v139_v19 = vld [vmem:[%s959_s4 + $0x98] sm:$0xff]  ;;  %v122_v22 = vld [vmem:[%s959_s4 + $0x10] sm:$0xff] }
   0x6   :  { %531 = vmatprep.subr.bf16.mxu0 %v530_v9  ;;  %v536_v20 = vpack.c.bf16 %v121_v17, %v120_v14  ;;  %v538_v21 = vpack.c.bf16 %v139_v19, %v138_v18  ;;  %v123_v23 = vld [vmem:[%s959_s4 + $0x18] sm:$0xff]  ;;  %v140_v24 = vld [vmem:[%s959_s4 + $0xa0] sm:$0xff]  ;;  %v141_v25 = vld [vmem:[%s959_s4 + $0xa8] sm:$0xff] }
   0x7   :  { %535 = vmatprep.subr.bf16.mxu1 %v534_v16  ;;  %v540_v26 = vpack.c.bf16 %v123_v23, %v122_v22  ;;  %v24_v27 = vld [vmem:[%s955_s0] sm:$0x3]  ;;  %v542_v28 = vpack.c.bf16 %v141_v25, %v140_v24  ;;  %v125_v30 = vld [vmem:[%s959_s4 + $0x28] sm:$0xff]  ;;  %v142_v31 = vld [vmem:[%s959_s4 + $0xb0] sm:$0xff] }
   0x8   :  { %537 = vmatpush3.bf16.msra.mxu1 %v536_v20  ;;  %v124_v29 = vld [vmem:[%s959_s4 + $0x20] sm:$0xff]  ;;  %v143_v32 = vld [vmem:[%s959_s4 + $0xb8] sm:$0xff]  ;;  %v126_v35 = vld [vmem:[%s959_s4 + $0x30] sm:$0xff] }
   0x9   :  { %533 = vmatpush1.bf16.msra.mxu0 %v532_v15  ;;  %539 = vmatprep.subr.bf16.mxu1 %v538_v21  ;;  %v544_v33 = vpack.c.bf16 %v125_v30, %v124_v29  ;;  %v546_v34 = vpack.c.bf16 %v143_v32, %v142_v31  ;;  %v127_v36 = vld [vmem:[%s959_s4 + $0x38] sm:$0xff] }
   0xc   :  { %490 = vmatmul.mubr.msk.f32.vlgmr.msra.gmra.mrb[0].mxu0 %vm45_vm0, %v24_v27  ;;  %541 = vmatpush3.bf16.msra.mxu1 %v540_v26 }
   0xd   :  { %543 = vmatprep.subr.bf16.mxu1 %v542_v28 }
   0xe   :  { %13 = vsyncpa [#allocation5], 0  ;;  %v144_v37 = vld [vmem:[%s959_s4 + $0xc0] sm:$0xff]  ;;  %v145_v38 = vld [vmem:[%s959_s4 + $0xc8] sm:$0xff]  ;;  %v548_v39 = vpack.c.bf16 %v127_v36, %v126_v35  ;;  %v35_v62 = vlaneseq  ;;  %vm233_vm1 = vcmask 1041409   ;;  %vm236_vm2 = vcmask 517120  }
   0xf   :  { %v550_v40 = vpack.c.bf16 %v145_v38, %v144_v37  ;;  %v128_v41 = vld [vmem:[%s959_s4 + $0x40] sm:$0xff]  ;;  %v129_v42 = vld [vmem:[%s959_s4 + $0x48] sm:$0xff]  ;;  %v146_v43 = vld [vmem:[%s959_s4 + $0xd0] sm:$0xff]  ;;  %vm324_vm3 = vcmask 7168   ;;  %vm326_vm4 = vcmask 15360   ;;  %vm328_vm5 = vcmask 23552  }
  0x10   :  { %545 = vmatpush3.bf16.msra.mxu1 %v544_v33  ;;  %v147_v44 = vld [vmem:[%s959_s4 + $0xd8] sm:$0xff]  ;;  %v552_v45 = vpack.c.bf16 %v129_v42, %v128_v41  ;;  %v130_v47 = vld [vmem:[%s959_s4 + $0x50] sm:$0xff]  ;;  %v148_v49 = vld [vmem:[%s959_s4 + $0xe0] sm:$0xff]  ;;  %v36_v63 = vshrl.u32 %v35_v62, 7  ;;  %vm330_vm6 = vcmask 31744   ;;  %vm332_vm7 = vcmask 39936  }
  0x11   :  { %547 = vmatprep.subr.bf16.mxu1 %v546_v34  ;;  %v554_v46 = vpack.c.bf16 %v147_v44, %v146_v43  ;;  %v131_v48 = vld [vmem:[%s959_s4 + $0x58] sm:$0xff]  ;;  %v149_v50 = vld [vmem:[%s959_s4 + $0xe8] sm:$0xff]  ;;  %v132_v53 = vld [vmem:[%s959_s4 + $0x60] sm:$0xff]  ;;  %vm334_vm8 = vcmask 48128   ;;  %vm336_vm9 = vcmask 56320   ;;  %vm338_vm10 = vcmask 58368  }
  0x12   :  { %v556_v51 = vpack.c.bf16 %v131_v48, %v130_v47  ;;  %v558_v52 = vpack.c.bf16 %v149_v50, %v148_v49  ;;  %v133_v54 = vld [vmem:[%s959_s4 + $0x68] sm:$0xff]  ;;  %v150_v56 = vld [vmem:[%s959_s4 + $0xf0] sm:$0xff]  ;;  %v151_v57 = vld [vmem:[%s959_s4 + $0xf8] sm:$0xff]  ;;  %v41_v0 = vsub.s32 1, %v36_v63  ;;  %v37_v2 = vsub.s32 0, %v36_v63 }
  0x13   :  { %v560_v55 = vpack.c.bf16 %v133_v54, %v132_v53  ;;  %v562_v58 = vpack.c.bf16 %v151_v57, %v150_v56  ;;  %v134_v59 = vld [vmem:[%s959_s4 + $0x70] sm:$0xff]  ;;  %v135_v60 = vld [vmem:[%s959_s4 + $0x78] sm:$0xff]  ;;  %v33_v1 = vld [vmem:[%s958_s3] sm:$0x3]  ;;  %vm353_vm11 = vcmask 64512   ;;  %s647_s3 = smov [#allocation4]  }
  0x14   :  { %549 = vmatpush3.bf16.msra.mxu1 %v548_v39  ;;  %v564_v61 = vpack.c.bf16 %v135_v60, %v134_v59  ;;  %v42_v3 = vrot.slane %v33_v1, %v41_v0  ;;  %v38_v4 = vrot.slane %v33_v1, %v37_v2  ;;  %v252_v12 = vld [vmem:[%s956_s1 + $0x2] sm:$0x1]  ;;  %v253_v13 = vld [vmem:[%s956_s1 + $0xa] sm:$0x1]  ;;  %v222_v14 = vld [vmem:[%s956_s1] sm:$0x1] }
  0x15   :  { %551 = vmatprep.subr.bf16.mxu1 %v550_v40  ;;  %v223_v15 = vld [vmem:[%s956_s1 + $0x8] sm:$0x1]  ;;  %v265_v16 = vld [vmem:[%s956_s1 + $0xb] sm:$0x1]  ;;  %v241_v17 = vld [vmem:[%s956_s1 + $0x9] sm:$0x1] }
  0x16   :  { %v289_v19 = vld [vmem:[%s956_s1 + $0xd] sm:$0x1]  ;;  %v277_v20 = vld [vmem:[%s956_s1 + $0xc] sm:$0x1]  ;;  %v264_v27 = vld [vmem:[%s956_s1 + $0x3] sm:$0x1] }
  0x17   :  { %v240_v28 = vld [vmem:[%s956_s1 + $0x1] sm:$0x1]  ;;  %v313_v35 = vld [vmem:[%s956_s1 + $0xf] sm:$0x1]  ;;  %v301_v36 = vld [vmem:[%s956_s1 + $0xe] sm:$0x1] }
  0x18   :  { %553 = vmatpush3.bf16.msra.mxu1 %v552_v45  ;;  %v288_v41 = vld [vmem:[%s956_s1 + $0x5] sm:$0x1]  ;;  %v276_v45 = vld [vmem:[%s956_s1 + $0x4] sm:$0x1]  ;;  %v300_v56 = vld [vmem:[%s956_s1 + $0x6] sm:$0x1] }
  0x19   :  { %555 = vmatprep.subr.bf16.mxu1 %v554_v46  ;;  %s478_s7 = sshll.u32 %s647_s3, 4  ;;  %s479_s7 = int_to_ptr.vmem [resolvable:$true] %s478_s7 }
  0x1a   :  { %s590_s8 = scalar_lea.vmem %s479_s7, 32  ;;  %p595_p1 = scmp.lt.s32.totalorder %s479_s7, %s479_s7 }
  0x1b   :  { %p591_p0 = scmp.ne.s32.totalorder %s479_s7, %s590_s8  ;;  %p596_p2 = scmp.lt.s32.totalorder %s590_s8, %s590_s8 }
  0x1c   :  { %557 = vmatpush3.bf16.msra.mxu1 %v556_v51 }
  0x1d   :  { %559 = vmatprep.subr.bf16.mxu1 %v558_v52  ;;  %p597_p3 = por %p596_p2, %p595_p1 }
  0x1f   :  { %p598_p4 = pnand %p597_p3, %p591_p0 }
  0x20   :  { %561 = vmatpush3.bf16.msra.mxu1 %v560_v55  ;;  %v312_v55 = vld [vmem:[%s956_s1 + $0x7] sm:$0x1] }
  0x21   :  { %563 = vmatprep.subr.bf16.mxu1 %v562_v58 }
  0x24   :  { %565 = vmatpush3.bf16.msra.mxu1 %v564_v61 }
  0xdf   :  { %v115_v5 = vpop.f32.mrb[0].mxu0 }
  0xe0   :  { %v117_v6 = vpop.f32.mrb[1].mxu0  ;;  %v116_v8 = vadd.f32 %v115_v5, %v38_v4 }
  0xe1   :  { %v118_v7 = vadd.f32 %v117_v6, %v42_v3 }
  0xe3   :  { %216 = vmatprep.mubr.f32.mxu1 %v118_v7 }
  0xe4   :  { %217 = vmatmul.mubr.f32.vlgmr.msra.gmra.mrb[0].mxu1 %v116_v8 }
 0x1b7   :  { %v523_v9 = vpop.f32.mrb[0].mxu1 }
 0x1b8   :  { %v524_v10 = vpop.f32.mrb[1].mxu1 }
 0x1b9   :  { %v525_v11 = vadd.f32 %v524_v10, %v523_v9 }
 0x1bb   :  { %v225_v18 = vrot.slane %v525_v11, 1  ;;  %v254_v25 = vmul.f32 %v525_v11, %v252_v12  ;;  %v228_v26 = vmul.f32 %v525_v11, %v222_v14  ;;  %v266_v39 = vmul.f32 %v525_v11, %v264_v27 }
 0x1bc   :  { %v242_v40 = vmul.f32 %v525_v11, %v240_v28  ;;  %v290_v51 = vmul.f32 %v525_v11, %v288_v41  ;;  %v278_v52 = vmul.f32 %v525_v11, %v276_v45  ;;  %v314_v61 = vmul.f32 %v525_v11, %v312_v55 }
 0x1bd   :  { %v255_v21 = vmul.f32 %v253_v13, %v225_v18  ;;  %v229_v22 = vmul.f32 %v225_v18, %v223_v15  ;;  %v267_v23 = vmul.f32 %v265_v16, %v225_v18  ;;  %v243_v24 = vmul.f32 %v241_v17, %v225_v18 }
 0x1be   :  { %v291_v29 = vmul.f32 %v289_v19, %v225_v18  ;;  %v279_v30 = vmul.f32 %v277_v20, %v225_v18  ;;  %v315_v46 = vmul.f32 %v313_v35, %v225_v18  ;;  %v303_v50 = vmul.f32 %v301_v36, %v225_v18 }
 0x1bf   :  { %v258_v31 = vrot.slane %v255_v21, 7  ;;  %v232_v32 = vrot.slane %v229_v22, 7  ;;  %v270_v33 = vrot.slane %v267_v23, 7  ;;  %v246_v34 = vrot.slane %v243_v24, 7 }
 0x1c0   :  { %v294_v44 = vrot.slane %v291_v29, 7  ;;  %v282_v49 = vrot.slane %v279_v30, 7  ;;  %v318_v59 = vrot.slane %v315_v46, 7  ;;  %v306_v60 = vrot.slane %v303_v50, 7 }
 0x1c1   :  { %v259_v37 = vsel %vm233_vm1, %v258_v31, %v254_v25  ;;  %v234_v38 = vsel %vm233_vm1, %v232_v32, %v228_v26  ;;  %v271_v47 = vsel %vm233_vm1, %v270_v33, %v266_v39  ;;  %v247_v48 = vsel %vm233_vm1, %v246_v34, %v242_v40 }
 0x1c2   :  { %v261_v42 = vsel %vm236_vm2, %v259_v37, 0.0  ;;  %v237_v43 = vsel %vm236_vm2, %v234_v38, 0.0  ;;  %v273_v53 = vsel %vm236_vm2, %v271_v47, 0.0  ;;  %v249_v54 = vsel %vm236_vm2, %v247_v48, 0.0 }
 0x1c3   :  { %262 = vadd.xlane.f32.xlu1 %v261_v42  ;;  %238 = vadd.xlane.f32.xlu0 %v237_v43  ;;  %v295_v57 = vsel %vm233_vm1, %v294_v44, %v290_v51  ;;  %v283_v58 = vsel %vm233_vm1, %v282_v49, %v278_v52  ;;  %v302_v62 = vmul.f32 %v525_v11, %v300_v56  ;;  %v639_v26 = vmov 1  }
 0x1c4   :  { %v297_v63 = vsel %vm236_vm2, %v295_v57, 0.0  ;;  %v285_v0 = vsel %vm236_vm2, %v283_v58, 0.0  ;;  %v319_v1 = vsel %vm233_vm1, %v318_v59, %v314_v61  ;;  %578 = vset.pattern.permute.xlu1 %v639_v26  ;;  %v640_v27 = vmov 0  }
 0x1c5   :  { %v307_v2 = vsel %vm233_vm1, %v306_v60, %v302_v62  ;;  %v321_v3 = vsel %vm236_vm2, %v319_v1, 0.0  ;;  %577 = vset.pattern.permute.xlu0 %v640_v27  ;;  %v641_v35 = vmov 2   ;;  %v642_v36 = vmov 7  }
 0x1c6   :  { %v309_v4 = vsel %vm236_vm2, %v307_v2, 0.0  ;;  %v643_v37 = vmov 3   ;;  %v644_v38 = vmov 4   ;;  %v645_v39 = vmov 5  }
 0x1c7   :  { %274 = vadd.xlane.f32.xlu1 %v273_v53  ;;  %250 = vadd.xlane.f32.xlu0 %v249_v54  ;;  %v646_v40 = vmov 6  }
 0x1cb   :  { %298 = vadd.xlane.f32.xlu1 %v297_v63  ;;  %286 = vadd.xlane.f32.xlu0 %v285_v0 }
 0x1cf   :  { %322 = vadd.xlane.f32.xlu1 %v321_v3  ;;  %310 = vadd.xlane.f32.xlu0 %v309_v4 }
 0x250   :  { %v263_v5 = vpop.xlane.xlu1 %262  ;;  %v239_v6 = vpop.xlane.xlu0 %238 }
 0x254   :  { %v275_v7 = vpop.xlane.xlu1 %274  ;;  %v251_v8 = vpop.xlane.xlu0 %250 }
 0x255   :  { %v325_v9 = vsel %vm324_vm3, %v239_v6, %v251_v8 }
 0x256   :  { %v327_v10 = vsel %vm326_vm4, %v325_v9, %v263_v5 }
 0x257   :  { %v329_v11 = vsel %vm328_vm5, %v327_v10, %v275_v7 }
 0x258   :  { %v299_v12 = vpop.xlane.xlu1 %298  ;;  %v287_v13 = vpop.xlane.xlu0 %286 }
 0x259   :  { %v331_v14 = vsel %vm330_vm6, %v329_v11, %v287_v13 }
 0x25a   :  { %v333_v16 = vsel %vm332_vm7, %v331_v14, %v299_v12 }
 0x25c   :  { %v323_v15 = vpop.xlane.xlu1 %322  ;;  %v311_v17 = vpop.xlane.xlu0 %310 }
 0x25d   :  { %v335_v18 = vsel %vm334_vm8, %v333_v16, %v311_v17 }
 0x25e   :  { %v337_v19 = vsel %vm336_vm9, %v335_v18, %v323_v15 }
 0x25f   :  { %v339_v20 = vsel %vm338_vm10, %v337_v19, -inf }
 0x260   :  { %340 = vmax.xlane.f32.xlu0 %v339_v20 }
 0x2ed   :  { %v341_v21 = vpop.xlane.xlu0 %340 }
 0x2ee   :  { %v342_v22 = vsub.f32 %v337_v19, %v341_v21 }
 0x2f0   :  { %v343_v23 = vmul.f32 1.442695, %v342_v22 }
 0x2f2   :  { %586 = vpow2.f32 %v343_v23 }
 0x2fc   :  { %v587_v24 = vpop.eup %586 }
 0x2fd   :  { %v345_v25 = vsel %vm338_vm10, %v587_v24, 0.0 }
 0x2fe   :  { %346 = vadd.xlane.f32.xlu1 %v345_v25 }
 0x38b   :  { %v347_v28 = vpop.xlane.xlu1 %346 }
 0x38c   :  { %588 = vrcp.f32 %v347_v28 }
 0x396   :  { %v589_v29 = vpop.eup %588 }
 0x397   :  { %v349_v30 = vmul.f32 %v589_v29, %v347_v28 }
 0x399   :  { %v350_v31 = vsub.f32 2.0, %v349_v30 }
 0x39b   :  { %v351_v32 = vmul.f32 %v589_v29, %v350_v31 }
 0x39d   :  { %v352_v33 = vmul.f32 %v587_v24, %v351_v32 }
 0x39f   :  { %373 = vperm.xlu1 %578, %v352_v33   ;;  %360 = vperm.xlu0 %577, %v352_v33   ;;  %v354_v34 = vsel %vm353_vm11, %v352_v33, 0.0 }
 0x3a0   :  { %355 = vst [vmem:[#allocation4] sm:$0x3] %v354_v34 }
 0x3a3   :  { %579 = vset.pattern.permute.xlu1 %v641_v35  ;;  %585 = vset.pattern.permute.xlu0 %v642_v36 }
 0x3a4   :  { %386 = vperm.xlu1 %579, %v352_v33  }
 0x3a8   :  { %580 = vset.pattern.permute.xlu1 %v643_v37 }
 0x3a9   :  { %399 = vperm.xlu1 %580, %v352_v33  }
 0x3ad   :  { %581 = vset.pattern.permute.xlu1 %v644_v38 }
 0x3ae   :  { %412 = vperm.xlu1 %581, %v352_v33  }
 0x3b2   :  { %582 = vset.pattern.permute.xlu1 %v645_v39 }
 0x3b3   :  { %425 = vperm.xlu1 %582, %v352_v33  }
 0x3b7   :  { %583 = vset.pattern.permute.xlu1 %v646_v40 }
 0x3b8   :  { %438 = vperm.xlu1 %583, %v352_v33  }
 0x3bc   :  { %584 = vset.pattern.permute.xlu1 %v642_v36 }
 0x3bd   :  { %451 = vperm.xlu1 %584, %v352_v33  }
 0x3be   :  { %601 = shalt.err (!%p598_p4)
}
 0x3bf   :  { %s602_s11 = scalar_lea.hbm %s961_s6, 32 }
 0x3c0   :  { %p603_p5 = scmp.ne.s32.totalorder %s961_s6, %s602_s11  ;;  %p606_p6 = scmp.lt.u32.totalorder %s602_s11, %s961_s6 }
 0x3c2   :  { %p608_p7 = pnand %p606_p6, %p603_p5 }
 0x3c4   :  { %611 = shalt.err (!%p608_p7)
}
 0x3c5   :  { %481 = dma.vmem_to_hbm [thread:$0]  %s479_s7, 32, %s961_s6, [#allocation5]   ;;  %v371_v43 = vld [vmem:[%s956_s1 + $0x9] sm:$0x1]  ;;  %v357_v44 = vld [vmem:[%s956_s1 + $0x8] sm:$0x1] }
 0x3c6   :  { %v384_v45 = vld [vmem:[%s956_s1 + $0xa] sm:$0x1]  ;;  %v378_v46 = vrot.slane %v371_v43, 7  ;;  %v365_v47 = vrot.slane %v357_v44, 7  ;;  %v370_v49 = vld [vmem:[%s956_s1 + $0x1] sm:$0x1] }
 0x3c7   :  { %v356_v50 = vld [vmem:[%s956_s1] sm:$0x1]  ;;  %v397_v51 = vld [vmem:[%s956_s1 + $0xb] sm:$0x1]  ;;  %v391_v52 = vrot.slane %v384_v45, 7  ;;  %s648_s20 = smov [#allocation2]  }
 0x3c8   :  { %v383_v53 = vld [vmem:[%s956_s1 + $0x2] sm:$0x1]  ;;  %v410_v54 = vld [vmem:[%s956_s1 + $0xc] sm:$0x1]  ;;  %v379_v55 = vsel %vm233_vm1, %v378_v46, %v370_v49  ;;  %v366_v56 = vsel %vm233_vm1, %v365_v47, %v356_v50  ;;  %v404_v58 = vrot.slane %v397_v51, 7  ;;  %s468_s2 = sshll.u32 %s648_s20, 4  ;;  %s469_s2 = int_to_ptr.vmem [resolvable:$true] %s468_s2 }
 0x3c9   :  { %v396_v59 = vld [vmem:[%s956_s1 + $0x3] sm:$0x1]  ;;  %v423_v61 = vld [vmem:[%s956_s1 + $0xd] sm:$0x1]  ;;  %v392_v62 = vsel %vm233_vm1, %v391_v52, %v383_v53  ;;  %v417_v63 = vrot.slane %v410_v54, 7  ;;  %s612_s21 = scalar_lea.vmem %s469_s2, 32  ;;  %p617_p9 = scmp.lt.s32.totalorder %s469_s2, %s469_s2 }
 0x3ca   :  { %v409_v2 = vld [vmem:[%s956_s1 + $0x4] sm:$0x1]  ;;  %v436_v3 = vld [vmem:[%s956_s1 + $0xe] sm:$0x1]  ;;  %v405_v4 = vsel %vm233_vm1, %v404_v58, %v396_v59  ;;  %v430_v5 = vrot.slane %v423_v61, 7  ;;  %p613_p8 = scmp.ne.s32.totalorder %s469_s2, %s612_s21  ;;  %p618_p10 = scmp.lt.s32.totalorder %s612_s21, %s612_s21 }
 0x3cb   :  { %v422_v7 = vld [vmem:[%s956_s1 + $0x5] sm:$0x1]  ;;  %v418_v8 = vsel %vm233_vm1, %v417_v63, %v409_v2  ;;  %v443_v10 = vrot.slane %v436_v3, 7  ;;  %v435_v13 = vld [vmem:[%s956_s1 + $0x6] sm:$0x1] }
 0x3cc   :  { %v449_v14 = vld [vmem:[%s956_s1 + $0xf] sm:$0x1]  ;;  %v431_v15 = vsel %vm233_vm1, %v430_v5, %v422_v7  ;;  %v448_v23 = vld [vmem:[%s956_s1 + $0x7] sm:$0x1]  ;;  %p619_p11 = por %p618_p10, %p617_p9 }
 0x3cd   :  { %v444_v18 = vsel %vm233_vm1, %v443_v10, %v435_v13  ;;  %v456_v19 = vrot.slane %v449_v14, 7 }
 0x3ce   :  { %p620_p12 = pnand %p619_p11, %p613_p8 }
 0x3cf   :  { %v457_v26 = vsel %vm233_vm1, %v456_v19, %v448_v23 }
 0x41e   :  { %v374_v41 = vpop.permute.xlu1 %373  ;;  %v361_v57 = vpop.permute.xlu0 %360 }
 0x41f   :  { %v381_v0 = vmul.f32 %v379_v55, %v374_v41  ;;  %v368_v1 = vmul.f32 %v366_v56, %v361_v57 }
 0x421   :  { %v382_v11 = vadd.f32 %v381_v0, %v368_v1 }
 0x423   :  { %v387_v42 = vpop.permute.xlu1 %386 }
 0x424   :  { %v394_v6 = vmul.f32 %v392_v62, %v387_v42 }
 0x426   :  { %v395_v16 = vadd.f32 %v394_v6, %v382_v11 }
 0x428   :  { %v400_v48 = vpop.permute.xlu1 %399 }
 0x429   :  { %v407_v12 = vmul.f32 %v405_v4, %v400_v48 }
 0x42b   :  { %v408_v20 = vadd.f32 %v407_v12, %v395_v16 }
 0x42d   :  { %v413_v60 = vpop.permute.xlu1 %412 }
 0x42e   :  { %v420_v17 = vmul.f32 %v418_v8, %v413_v60 }
 0x430   :  { %v421_v24 = vadd.f32 %v420_v17, %v408_v20 }
 0x432   :  { %v426_v9 = vpop.permute.xlu1 %425 }
 0x433   :  { %v433_v21 = vmul.f32 %v431_v15, %v426_v9 }
 0x435   :  { %v434_v27 = vadd.f32 %v433_v21, %v421_v24 }
 0x437   :  { %v439_v22 = vpop.permute.xlu1 %438 }
 0x438   :  { %v446_v25 = vmul.f32 %v444_v18, %v439_v22 }
 0x43a   :  { %v447_v29 = vadd.f32 %v446_v25, %v434_v27 }
 0x43c   :  { %v452_v28 = vpop.permute.xlu1 %451 }
 0x43d   :  { %v459_v30 = vmul.f32 %v457_v26, %v452_v28 }
 0x43f   :  { %v460_v31 = vadd.f32 %v459_v30, %v447_v29 }
 0x441   :  { %461 = vst.msk [vmem:[#allocation2] sm:$0x3] %vm236_vm2, %v460_v31 }
 0x442   :  { %623 = shalt.err (!%p620_p12)
}
 0x443   :  { %s624_s23 = scalar_lea.hbm %s960_s5, 32 }
 0x444   :  { %p625_p13 = scmp.ne.s32.totalorder %s960_s5, %s624_s23  ;;  %p628_p0 = scmp.lt.u32.totalorder %s624_s23, %s960_s5 }
 0x446   :  { %p630_p1 = pnand %p628_p0, %p625_p13 }
 0x448   :  { %633 = shalt.err (!%p630_p1)
}
 0x449   :  { %471 = dma.vmem_to_hbm [thread:$0]  %s469_s2, 32, %s960_s5, [#allocation3]  }
 0x44a   :  { %634 = dma.done.wait [#allocation3], 32  }
 0x44b   :  { %635 = vsyncadd [#allocation3], 4294967264 }
 0x44c   :  { %636 = dma.done.wait [#allocation5], 32  }
 0x44d   :  { %637 = vsyncadd [#allocation5], 4294967264 }
 0x44e   :  { %488 = vsyncpa [#allocation3], 1 }
 0x44f   :  { %489 = vsyncpa [#allocation5], 1 }

</bundles_post_ra>
